<compile_context>
chip_gen: v6e
topology: v6e:2x2x1
jax: 0.10.0
libtpu: 0.0.40
codegen_flags: <defaults>
</compile_context>

<pallas_src>
import jax
import jax.numpy as jnp
from jax.experimental import pallas as pl
from jax.experimental.pallas import tpu as pltpu

H1, H2, H3 = 500, 300, 100          # logical hidden sizes (torch module)
H1P, H2P, H3P = 512, 384, 128       # lane-padded hidden sizes


def _round_up(x, m):
    return (x + m - 1) // m * m


def dcritic_kernel(s_ref, a_ref,
                   w1s_ref, w1a_ref, b1_ref,
                   w2_ref, b2_ref,
                   w3_ref, b3_ref,
                   w4_ref, b4_ref,
                   o_ref):
    # ----- layer 1: fused concat via split weight, bf16 MXU, f32 accumulate
    s = s_ref[...].astype(jnp.bfloat16)
    a = a_ref[...].astype(jnp.bfloat16)
    h = (jnp.dot(s, w1s_ref[...], preferred_element_type=jnp.float32)
         + jnp.dot(a, w1a_ref[...], preferred_element_type=jnp.float32)
         + b1_ref[...])
    h = jnp.maximum(h, 0.0)

    # ----- layer 2
    h = jnp.dot(h.astype(jnp.bfloat16), w2_ref[...],
                preferred_element_type=jnp.float32) + b2_ref[...]
    h = jnp.maximum(h, 0.0)

    # ----- layer 3
    h = jnp.dot(h.astype(jnp.bfloat16), w3_ref[...],
                preferred_element_type=jnp.float32) + b3_ref[...]
    h = jnp.maximum(h, 0.0)

    # ----- layer 4: [TM, H3P] x [H3P] -> [TM, 1] as a lane reduce (f32)
    q = jnp.sum(h * w4_ref[...], axis=-1, keepdims=True) + b4_ref[...]
    o_ref[...] = q.astype(o_ref.dtype)


def dcritic_forward(state, action, params):
    """state: [B, state_dim] f32, action: [B, action_dim] f32 -> [B, 1] f32."""
    w1s, w1a, b1, w2, b2, w3, b3, w4, b4 = params
    B, S = state.shape
    A = action.shape[1]

    # batch tiling: TM rows per grid step (multiple of 8)
    TM = 128 if B >= 128 else _round_up(B, 8)
    B_pad = _round_up(B, TM)
    if B_pad != B:
        state = jnp.pad(state, ((0, B_pad - B), (0, 0)))
        action = jnp.pad(action, ((0, B_pad - B), (0, 0)))
    grid = (B_pad // TM,)

    def const_spec(arr):
        # full-array block, constant index map -> stays resident in VMEM
        return pl.BlockSpec(arr.shape, lambda i: (0,) * arr.ndim)

    out = pl.pallas_call(
        dcritic_kernel,
        out_shape=jax.ShapeDtypeStruct((B_pad, 1), jnp.float32),
        grid=grid,
        in_specs=[
            pl.BlockSpec((TM, S), lambda i: (i, 0)),   # state tile
            pl.BlockSpec((TM, A), lambda i: (i, 0)),   # action tile
            const_spec(w1s), const_spec(w1a), const_spec(b1),
            const_spec(w2), const_spec(b2),
            const_spec(w3), const_spec(b3),
            const_spec(w4), const_spec(b4),
        ],
        out_specs=pl.BlockSpec((TM, 1), lambda i: (i, 0)),
        compiler_params=pltpu.CompilerParams(
            dimension_semantics=("parallel",),   # megacore sharding on v7x
            vmem_limit_bytes=8 << 20,            # kernel needs < 2 MiB
        ),
    )(state, action, w1s, w1a, b1, w2, b2, w3, b3, w4, b4)
    return out[:B]


def init_params(key, state_dim, action_dim):
    """Torch-style uniform init on the logical shapes, zero-padded to lane
    multiples.  Matmul weights stored bf16 ([in, out]); biases / final weight
    row stay f32."""
    ks = jax.random.split(key, 9)
    sa = state_dim + action_dim

    # layer 1 (split into state / action halves)
    bd1 = 1.0 / (sa ** 0.5)
    w1s = jax.random.uniform(ks[0], (state_dim, H1), jnp.float32, -bd1, bd1)
    w1a = jax.random.uniform(ks[1], (action_dim, H1), jnp.float32, -bd1, bd1)
    b1 = jax.random.uniform(ks[2], (1, H1), jnp.float32, -bd1, bd1)
    w1s = jnp.pad(w1s, ((0, 0), (0, H1P - H1))).astype(jnp.bfloat16)
    w1a = jnp.pad(w1a, ((0, 0), (0, H1P - H1))).astype(jnp.bfloat16)
    b1 = jnp.pad(b1, ((0, 0), (0, H1P - H1)))

    # layer 2
    bd2 = 1.0 / (H1 ** 0.5)
    w2 = jax.random.uniform(ks[3], (H1, H2), jnp.float32, -bd2, bd2)
    b2 = jax.random.uniform(ks[4], (1, H2), jnp.float32, -bd2, bd2)
    w2 = jnp.pad(w2, ((0, H1P - H1), (0, H2P - H2))).astype(jnp.bfloat16)
    b2 = jnp.pad(b2, ((0, 0), (0, H2P - H2)))

    # layer 3
    bd3 = 1.0 / (H2 ** 0.5)
    w3 = jax.random.uniform(ks[5], (H2, H3), jnp.float32, -bd3, bd3)
    b3 = jax.random.uniform(ks[6], (1, H3), jnp.float32, -bd3, bd3)
    w3 = jnp.pad(w3, ((0, H2P - H2), (0, H3P - H3))).astype(jnp.bfloat16)
    b3 = jnp.pad(b3, ((0, 0), (0, H3P - H3)))

    # layer 4 (stored as a single f32 row, used via multiply + reduce)
    bd4 = 1.0 / (H3 ** 0.5)
    w4 = jax.random.uniform(ks[7], (1, H3), jnp.float32, -bd4, bd4)
    w4 = jnp.pad(w4, ((0, 0), (0, H3P - H3)))
    b4 = jax.random.uniform(ks[8], (1, 1), jnp.float32, -bd4, bd4)

    return (w1s, w1a, b1, w2, b2, w3, b3, w4, b4)


if __name__ == "__main__":
    key = jax.random.PRNGKey(0)
    k_params, k_state, k_action = jax.random.split(key, 3)

    batch, state_dim, action_dim = 2, 16, 8
    params = init_params(k_params, state_dim, action_dim)
    state = jax.random.normal(k_state, (batch, state_dim), jnp.float32)
    action = jax.random.normal(k_action, (batch, action_dim), jnp.float32)

    out = dcritic_forward(state, action, params)
    jax.block_until_ready(out)
    assert out.shape == (batch, 1)

    # pure-JAX reference following the same bf16-input / f32-accumulate path
    w1s, w1a, b1, w2, b2, w3, b3, w4, b4 = params
    h = (jnp.dot(state.astype(jnp.bfloat16), w1s,
                 preferred_element_type=jnp.float32)
         + jnp.dot(action.astype(jnp.bfloat16), w1a,
                   preferred_element_type=jnp.float32) + b1)
    h = jnp.maximum(h, 0.0)
    h = jnp.dot(h.astype(jnp.bfloat16), w2,
                preferred_element_type=jnp.float32) + b2
    h = jnp.maximum(h, 0.0)
    h = jnp.dot(h.astype(jnp.bfloat16), w3,
                preferred_element_type=jnp.float32) + b3
    h = jnp.maximum(h, 0.0)
    ref = jnp.sum(h * w4, axis=-1, keepdims=True) + b4

    assert jnp.allclose(out, ref, atol=1e-3, rtol=1e-3), "mismatch vs reference"

    print("KERNEL_OK")
</pallas_src>

<mosaic_0001>
module attributes {stable_mosaic.version = 11 : i64} {
  func.func @dcritic_kernel(%arg0: i32, %arg1: memref<8x16xf32, #tpu.memory_space<vmem>>, %arg2: memref<8x8xf32, #tpu.memory_space<vmem>>, %arg3: memref<16x512xbf16, #tpu.memory_space<vmem>>, %arg4: memref<8x512xbf16, #tpu.memory_space<vmem>>, %arg5: memref<1x512xf32, #tpu.memory_space<vmem>>, %arg6: memref<512x384xbf16, #tpu.memory_space<vmem>>, %arg7: memref<1x384xf32, #tpu.memory_space<vmem>>, %arg8: memref<384x128xbf16, #tpu.memory_space<vmem>>, %arg9: memref<1x128xf32, #tpu.memory_space<vmem>>, %arg10: memref<1x128xf32, #tpu.memory_space<vmem>>, %arg11: memref<1x1xf32, #tpu.memory_space<vmem>>, %arg12: memref<8x1xf32, #tpu.memory_space<vmem>>) attributes {dimension_semantics = [#tpu.dimension_semantics<parallel>], iteration_bounds = array<i64: 1>, scalar_prefetch = 0 : i64, scratch_operands = 0 : i64, tpu.core_type = #tpu.core_type<tc>, window_params = [{transform_indices = @transform_0, window_bounds = array<i64: 8, 16>}, {transform_indices = @transform_1, window_bounds = array<i64: 8, 8>}, {pipeline_mode = #tpu.pipeline_mode<synchronous>, transform_indices = @transform_2, window_bounds = array<i64: 16, 512>}, {pipeline_mode = #tpu.pipeline_mode<synchronous>, transform_indices = @transform_3, window_bounds = array<i64: 8, 512>}, {pipeline_mode = #tpu.pipeline_mode<synchronous>, transform_indices = @transform_4, window_bounds = array<i64: 1, 512>}, {pipeline_mode = #tpu.pipeline_mode<synchronous>, transform_indices = @transform_5, window_bounds = array<i64: 512, 384>}, {pipeline_mode = #tpu.pipeline_mode<synchronous>, transform_indices = @transform_6, window_bounds = array<i64: 1, 384>}, {pipeline_mode = #tpu.pipeline_mode<synchronous>, transform_indices = @transform_7, window_bounds = array<i64: 384, 128>}, {pipeline_mode = #tpu.pipeline_mode<synchronous>, transform_indices = @transform_8, window_bounds = array<i64: 1, 128>}, {pipeline_mode = #tpu.pipeline_mode<synchronous>, transform_indices = @transform_9, window_bounds = array<i64: 1, 128>}, {pipeline_mode = #tpu.pipeline_mode<synchronous>, transform_indices = @transform_10, window_bounds = array<i64: 1, 1>}, {transform_indices = @transform_11, window_bounds = array<i64: 8, 1>}]} {
    %c0 = arith.constant 0 : index
    %c0_0 = arith.constant 0 : index
    %0 = vector.load %arg1[%c0, %c0_0] : memref<8x16xf32, #tpu.memory_space<vmem>>, vector<8x16xf32>
    %1 = arith.truncf %0 : vector<8x16xf32> to vector<8x16xbf16>
    %c0_1 = arith.constant 0 : index
    %c0_2 = arith.constant 0 : index
    %2 = vector.load %arg2[%c0_1, %c0_2] : memref<8x8xf32, #tpu.memory_space<vmem>>, vector<8x8xf32>
    %3 = arith.truncf %2 : vector<8x8xf32> to vector<8x8xbf16>
    %c0_3 = arith.constant 0 : index
    %c0_4 = arith.constant 0 : index
    %4 = vector.load %arg3[%c0_3, %c0_4] : memref<16x512xbf16, #tpu.memory_space<vmem>>, vector<16x512xbf16>
    %cst = arith.constant dense<0.000000e+00> : vector<8x512xf32>
    %5 = tpu.matmul %1, %4, %cst {dimension_numbers = #tpu.dot_dimension_numbers<[1], [0], [0], [1], [0, 0, 1, 1], [], []>} : vector<8x16xbf16>, vector<16x512xbf16>, vector<8x512xf32> -> vector<8x512xf32>
    %c0_5 = arith.constant 0 : index
    %c0_6 = arith.constant 0 : index
    %6 = vector.load %arg4[%c0_5, %c0_6] : memref<8x512xbf16, #tpu.memory_space<vmem>>, vector<8x512xbf16>
    %cst_7 = arith.constant dense<0.000000e+00> : vector<8x512xf32>
    %7 = tpu.matmul %3, %6, %cst_7 {dimension_numbers = #tpu.dot_dimension_numbers<[1], [0], [0], [1], [0, 0, 1, 1], [], []>} : vector<8x8xbf16>, vector<8x512xbf16>, vector<8x512xf32> -> vector<8x512xf32>
    %8 = arith.addf %5, %7 : vector<8x512xf32>
    %c0_8 = arith.constant 0 : index
    %c0_9 = arith.constant 0 : index
    %9 = vector.load %arg5[%c0_8, %c0_9] : memref<1x512xf32, #tpu.memory_space<vmem>>, vector<1x512xf32>
    %10 = vector.broadcast %9 : vector<1x512xf32> to vector<8x512xf32>
    %11 = arith.addf %8, %10 : vector<8x512xf32>
    %cst_10 = arith.constant 0.000000e+00 : f32
    %12 = vector.broadcast %cst_10 : f32 to vector<8x512xf32>
    %13 = arith.maximumf %11, %12 : vector<8x512xf32>
    %14 = arith.truncf %13 : vector<8x512xf32> to vector<8x512xbf16>
    %c0_11 = arith.constant 0 : index
    %c0_12 = arith.constant 0 : index
    %15 = vector.load %arg6[%c0_11, %c0_12] : memref<512x384xbf16, #tpu.memory_space<vmem>>, vector<512x384xbf16>
    %cst_13 = arith.constant dense<0.000000e+00> : vector<8x384xf32>
    %16 = tpu.matmul %14, %15, %cst_13 {dimension_numbers = #tpu.dot_dimension_numbers<[1], [0], [0], [1], [0, 0, 1, 1], [], []>} : vector<8x512xbf16>, vector<512x384xbf16>, vector<8x384xf32> -> vector<8x384xf32>
    %c0_14 = arith.constant 0 : index
    %c0_15 = arith.constant 0 : index
    %17 = vector.load %arg7[%c0_14, %c0_15] : memref<1x384xf32, #tpu.memory_space<vmem>>, vector<1x384xf32>
    %18 = vector.broadcast %17 : vector<1x384xf32> to vector<8x384xf32>
    %19 = arith.addf %16, %18 : vector<8x384xf32>
    %cst_16 = arith.constant 0.000000e+00 : f32
    %20 = vector.broadcast %cst_16 : f32 to vector<8x384xf32>
    %21 = arith.maximumf %19, %20 : vector<8x384xf32>
    %22 = arith.truncf %21 : vector<8x384xf32> to vector<8x384xbf16>
    %c0_17 = arith.constant 0 : index
    %c0_18 = arith.constant 0 : index
    %23 = vector.load %arg8[%c0_17, %c0_18] : memref<384x128xbf16, #tpu.memory_space<vmem>>, vector<384x128xbf16>
    %cst_19 = arith.constant dense<0.000000e+00> : vector<8x128xf32>
    %24 = tpu.matmul %22, %23, %cst_19 {dimension_numbers = #tpu.dot_dimension_numbers<[1], [0], [0], [1], [0, 0, 1, 1], [], []>} : vector<8x384xbf16>, vector<384x128xbf16>, vector<8x128xf32> -> vector<8x128xf32>
    %c0_20 = arith.constant 0 : index
    %c0_21 = arith.constant 0 : index
    %25 = vector.load %arg9[%c0_20, %c0_21] : memref<1x128xf32, #tpu.memory_space<vmem>>, vector<1x128xf32>
    %26 = vector.broadcast %25 : vector<1x128xf32> to vector<8x128xf32>
    %27 = arith.addf %24, %26 : vector<8x128xf32>
    %cst_22 = arith.constant 0.000000e+00 : f32
    %28 = vector.broadcast %cst_22 : f32 to vector<8x128xf32>
    %29 = arith.maximumf %27, %28 : vector<8x128xf32>
    %c0_23 = arith.constant 0 : index
    %c0_24 = arith.constant 0 : index
    %30 = vector.load %arg10[%c0_23, %c0_24] : memref<1x128xf32, #tpu.memory_space<vmem>>, vector<1x128xf32>
    %31 = vector.broadcast %30 : vector<1x128xf32> to vector<8x128xf32>
    %32 = arith.mulf %29, %31 : vector<8x128xf32>
    %cst_25 = arith.constant dense<0.000000e+00> : vector<8xf32>
    %33 = vector.multi_reduction <add>, %32, %cst_25 [1] : vector<8x128xf32> to vector<8xf32>
    %34 = vector.shape_cast %33 : vector<8xf32> to vector<8x1xf32>
    %c0_26 = arith.constant 0 : index
    %c0_27 = arith.constant 0 : index
    %35 = vector.load %arg11[%c0_26, %c0_27] : memref<1x1xf32, #tpu.memory_space<vmem>>, vector<1x1xf32>
    %36 = vector.broadcast %35 : vector<1x1xf32> to vector<8x1xf32>
    %37 = arith.addf %34, %36 : vector<8x1xf32>
    %c0_28 = arith.constant 0 : index
    %c0_29 = arith.constant 0 : index
    %38 = vector.load %arg12[%c0_28, %c0_29] : memref<8x1xf32, #tpu.memory_space<vmem>>, vector<8x1xf32>
    tpu.vector_store %arg12[%c0_28, %c0_29], %37 {strides = array<i32>} : memref<8x1xf32, #tpu.memory_space<vmem>>, vector<8x1xf32>,
    return
  }
  func.func @transform_0(%arg0: i32) -> (i32, i32) {
    %c0_i32 = arith.constant 0 : i32
    %c0_i32_0 = arith.constant 0 : i32
    return %arg0, %c0_i32 : i32, i32
  }
  func.func @transform_1(%arg0: i32) -> (i32, i32) {
    %c0_i32 = arith.constant 0 : i32
    %c0_i32_0 = arith.constant 0 : i32
    return %arg0, %c0_i32 : i32, i32
  }
  func.func @transform_2(%arg0: i32) -> (i32, i32) {
    %c0_i32 = arith.constant 0 : i32
    %c0_i32_0 = arith.constant 0 : i32
    %c0_i32_1 = arith.constant 0 : i32
    return %c0_i32, %c0_i32_0 : i32, i32
  }
  func.func @transform_3(%arg0: i32) -> (i32, i32) {
    %c0_i32 = arith.constant 0 : i32
    %c0_i32_0 = arith.constant 0 : i32
    %c0_i32_1 = arith.constant 0 : i32
    return %c0_i32, %c0_i32_0 : i32, i32
  }
  func.func @transform_4(%arg0: i32) -> (i32, i32) {
    %c0_i32 = arith.constant 0 : i32
    %c0_i32_0 = arith.constant 0 : i32
    %c0_i32_1 = arith.constant 0 : i32
    return %c0_i32, %c0_i32_0 : i32, i32
  }
  func.func @transform_5(%arg0: i32) -> (i32, i32) {
    %c0_i32 = arith.constant 0 : i32
    %c0_i32_0 = arith.constant 0 : i32
    %c0_i32_1 = arith.constant 0 : i32
    return %c0_i32, %c0_i32_0 : i32, i32
  }
  func.func @transform_6(%arg0: i32) -> (i32, i32) {
    %c0_i32 = arith.constant 0 : i32
    %c0_i32_0 = arith.constant 0 : i32
    %c0_i32_1 = arith.constant 0 : i32
    return %c0_i32, %c0_i32_0 : i32, i32
  }
  func.func @transform_7(%arg0: i32) -> (i32, i32) {
    %c0_i32 = arith.constant 0 : i32
    %c0_i32_0 = arith.constant 0 : i32
    %c0_i32_1 = arith.constant 0 : i32
    return %c0_i32, %c0_i32_0 : i32, i32
  }
  func.func @transform_8(%arg0: i32) -> (i32, i32) {
    %c0_i32 = arith.constant 0 : i32
    %c0_i32_0 = arith.constant 0 : i32
    %c0_i32_1 = arith.constant 0 : i32
    return %c0_i32, %c0_i32_0 : i32, i32
  }
  func.func @transform_9(%arg0: i32) -> (i32, i32) {
    %c0_i32 = arith.constant 0 : i32
    %c0_i32_0 = arith.constant 0 : i32
    %c0_i32_1 = arith.constant 0 : i32
    return %c0_i32, %c0_i32_0 : i32, i32
  }
  func.func @transform_10(%arg0: i32) -> (i32, i32) {
    %c0_i32 = arith.constant 0 : i32
    %c0_i32_0 = arith.constant 0 : i32
    %c0_i32_1 = arith.constant 0 : i32
    return %c0_i32, %c0_i32_0 : i32, i32
  }
  func.func @transform_11(%arg0: i32) -> (i32, i32) {
    %c0_i32 = arith.constant 0 : i32
    %c0_i32_0 = arith.constant 0 : i32
    return %arg0, %c0_i32 : i32, i32
  }
}

</mosaic_0001>

<bundles_post_ra>
// kernel: tpu_custom_call.1
= control target key start
LH: loop header
LB: loop body
LE: loop exit
PB: predicated region body
PF: predicated region fallthrough
CT: control target
= control target key end

     0   :  { %s2183_s0 = inlined_call_operand.hbm [shape: f32[8,16], index: 0, kind: input, shape index: {}]   ;;  %s2184_s1 = inlined_call_operand.hbm [shape: f32[8,8], index: 1, kind: input, shape index: {}]   ;;  %s2185_s2 = inlined_call_operand.hbm [shape: bf16[16,512], index: 2, kind: input, shape index: {}]   ;;  %s2186_s3 = inlined_call_operand.hbm [shape: bf16[8,512], index: 3, kind: input, shape index: {}]   ;;  %s2187_s4 = inlined_call_operand.vmem [shape: f32[1,512], index: 4, kind: input, shape index: {}]   ;;  %s2188_s5 = inlined_call_operand.hbm [shape: bf16[512,384], index: 5, kind: input, shape index: {}]   ;;  %s2189_s6 = inlined_call_operand.vmem [shape: f32[1,384], index: 6, kind: input, shape index: {}]   ;;  %s2190_s7 = inlined_call_operand.hbm [shape: bf16[384,128], index: 7, kind: input, shape index: {}]   ;;  %s2191_s8 = inlined_call_operand.vmem [shape: f32[1,128], index: 8, kind: input, shape index: {}]   ;;  %s2192_s9 = inlined_call_operand.vmem [shape: f32[1,128], index: 9, kind: input, shape index: {}]   ;;  %s2193_s10 = inlined_call_operand.<no memory space> [shape: f32[1,1], index: 10, kind: input, shape index: {}]   ;;  %s2194_s11 = inlined_call_operand.vmem [shape: f32[8,1], index: 11, kind: output, shape index: {}]  }
   0x1   :  { %v16_v0 = vstv %s2193_s10 }
   0x2   :  { %17 = vst [vmem:[#allocation2] sm:$0x1] %v16_v0 }
   0x3   :  { %18 = vsyncpa [#allocation4], 0 }
   0x4   :  { %19 = vsyncpa [#allocation6], 0 }
   0x5   :  { %20 = vsyncpa [#allocation9], 0 }
   0x6   :  { %21 = vsyncpa [#allocation12], 0  ;;  %s2046_s19 = smov [#allocation5]   ;;  %s2047_s21 = smov [#allocation8]  }
   0x7   :  { %s38_s20 = sshll.u32 %s2046_s19, 4  ;;  %s60_s22 = sshll.u32 %s2047_s21, 4  ;;  %s39_s20 = int_to_ptr.vmem [resolvable:$true] %s38_s20  ;;  %s61_s22 = int_to_ptr.vmem [resolvable:$true] %s60_s22 }
   0x8   :  { %s1926_s23 = scalar_lea.vmem %s39_s20, 128  ;;  %p1931_p1 = scmp.lt.s32.totalorder %s39_s20, %s39_s20 }
   0x9   :  { %p1927_p0 = scmp.ne.s32.totalorder %s39_s20, %s1926_s23  ;;  %p1932_p2 = scmp.lt.s32.totalorder %s1926_s23, %s1926_s23 }
   0xb   :  { %p1933_p3 = por %p1932_p2, %p1931_p1 }
   0xd   :  { %p1934_p4 = pnand %p1933_p3, %p1927_p0 }
   0xf   :  { %1937 = shalt.err (!%p1934_p4)
}
  0x10   :  { %41 = dma.hbm_to_vmem [thread:$0]  %s2184_s1, 128, %s39_s20, [#allocation6]  }
  0x11   :  { %s1946_s25 = scalar_lea.vmem %s61_s22, 256  ;;  %p1951_p6 = scmp.lt.s32.totalorder %s61_s22, %s61_s22 }
  0x12   :  { %p1947_p5 = scmp.ne.s32.totalorder %s61_s22, %s1946_s25  ;;  %p1952_p7 = scmp.lt.s32.totalorder %s1946_s25, %s1946_s25 }
  0x14   :  { %p1953_p8 = por %p1952_p7, %p1951_p6 }
  0x16   :  { %p1954_p9 = pnand %p1953_p8, %p1947_p5 }
  0x18   :  { %1957 = shalt.err (!%p1954_p9)
}
  0x19   :  { %63 = dma.hbm_to_vmem [thread:$0]  %s2186_s3, 256, %s61_s22, [#allocation9]  }
  0x1a   :  { %s2048_s28 = smov [#allocation3]   ;;  %s2049_s30 = smov [#allocation7]  }
  0x1b   :  { %s28_s29 = sshll.u32 %s2048_s28, 4  ;;  %s47_s12 = sshll.u32 %s2049_s30, 4  ;;  %s29_s29 = int_to_ptr.vmem [resolvable:$true] %s28_s29  ;;  %s48_s12 = int_to_ptr.vmem [resolvable:$true] %s47_s12 }
  0x1c   :  { %s1966_s13 = scalar_lea.vmem %s29_s29, 128  ;;  %p1971_p11 = scmp.lt.s32.totalorder %s29_s29, %s29_s29 }
  0x1d   :  { %p1967_p10 = scmp.ne.s32.totalorder %s29_s29, %s1966_s13  ;;  %p1972_p12 = scmp.lt.s32.totalorder %s1966_s13, %s1966_s13 }
  0x1f   :  { %p1973_p13 = por %p1972_p12, %p1971_p11 }
  0x21   :  { %p1974_p0 = pnand %p1973_p13, %p1967_p10 }
  0x23   :  { %1977 = shalt.err (!%p1974_p0)
}
  0x24   :  { %31 = dma.hbm_to_vmem [thread:$0]  %s2183_s0, 128, %s29_s29, [#allocation4]  }
  0x25   :  { %s1986_s15 = scalar_lea.vmem %s48_s12, 512  ;;  %p1991_p2 = scmp.lt.s32.totalorder %s48_s12, %s48_s12 }
  0x26   :  { %p1987_p1 = scmp.ne.s32.totalorder %s48_s12, %s1986_s15  ;;  %p1992_p3 = scmp.lt.s32.totalorder %s1986_s15, %s1986_s15 }
  0x28   :  { %p1993_p4 = por %p1992_p3, %p1991_p2 }
  0x2a   :  { %p1994_p5 = pnand %p1993_p4, %p1987_p1 }
  0x2c   :  { %1997 = shalt.err (!%p1994_p5)
}
  0x2d   :  { %s2050_s3 = smov 256   ;;  %s2051_s16 = smov 16  }
  0x2e   :  { %53 = dma.hbm_to_vmem [thread:$0]  %s2185_s2, 512, %s48_s12, [#allocation6], %s2050_s3, %s2050_s3, %s2051_s16  }
  0x2f   :  { %s2052_s19 = smov [#allocation10]  }
  0x30   :  { %s71_s20 = sshll.u32 %s2052_s19, 4  ;;  %s72_s20 = int_to_ptr.vmem [resolvable:$true] %s71_s20 }
  0x31   :  { %s2006_s21 = scalar_lea.vmem %s72_s20, 12288  ;;  %p2011_p7 = scmp.lt.s32.totalorder %s72_s20, %s72_s20 }
  0x32   :  { %p2007_p6 = scmp.ne.s32.totalorder %s72_s20, %s2006_s21  ;;  %p2012_p8 = scmp.lt.s32.totalorder %s2006_s21, %s2006_s21 }
  0x34   :  { %p2013_p9 = por %p2012_p8, %p2011_p7 }
  0x36   :  { %p2014_p10 = pnand %p2013_p9, %p2007_p6 }
  0x38   :  { %2017 = shalt.err (!%p2014_p10)
}
  0x39   :  { %s2053_s0 = smov 192   ;;  %s2054_s22 = smov 12  }
  0x3a   :  { %77 = dma.hbm_to_vmem [thread:$0]  %s2188_s5, 12288, %s72_s20, [#allocation9], %s2053_s0, %s2053_s0, %s2054_s22  }
  0x3b   :  { %s2055_s10 = smov [#allocation11]  }
  0x3c   :  { %s85_s25 = sshll.u32 %s2055_s10, 4  ;;  %s86_s25 = int_to_ptr.vmem [resolvable:$true] %s85_s25 }
  0x3d   :  { %s2026_s2 = scalar_lea.vmem %s86_s25, 3072  ;;  %p2031_p12 = scmp.lt.s32.totalorder %s86_s25, %s86_s25 }
  0x3e   :  { %p2027_p11 = scmp.ne.s32.totalorder %s86_s25, %s2026_s2  ;;  %p2032_p13 = scmp.lt.s32.totalorder %s2026_s2, %s2026_s2 }
  0x40   :  { %p2033_p0 = por %p2032_p13, %p2031_p12 }
  0x42   :  { %p2034_p1 = pnand %p2033_p0, %p2027_p11 }
  0x44   :  { %2037 = shalt.err (!%p2034_p1)
}
  0x45   :  { %s2056_s26 = smov 64   ;;  %s2057_s27 = smov 4  }
  0x46   :  { %91 = dma.hbm_to_vmem [thread:$0]  %s2190_s7, 3072, %s86_s25, [#allocation12], %s2056_s26, %s2056_s26, %s2057_s27  }
  0x47   :  { %2038 = dma.done.wait [#allocation4], 128  }
  0x48   :  { %2039 = vsyncadd [#allocation4], 4294967168 }
  0x49   :  { %2040 = dma.done.wait [#allocation6], 640  }
  0x4a   :  { %2041 = vsyncadd [#allocation6], 4294966656 }
  0x4b   :  { %2042 = dma.done.wait [#allocation9], 12544  }
  0x4c   :  { %2043 = vsyncadd [#allocation9], 4294954752 }
  0x4d   :  { %2044 = dma.done.wait [#allocation12], 3072  }
  0x4e   :  { %2045 = vsyncadd [#allocation12], 4294964224  ;;  %v2058_v1 = vmov 0   ;;  %v125_v2 = vld [vmem:[#allocation8] sm:$0xff]  ;;  %vm141_vm0 = vcmask 1043456   ;;  %v126_v3 = vld [vmem:[#allocation8 + $0x8] sm:$0xff] }
  0x4f   :  { %186 = vmatprep.mubr.bf16.mxu0 %v2058_v1  ;;  %227 = vmatprep.mubr.bf16.mxu1 %v2058_v1  ;;  %v119_v4 = vld [vmem:[#allocation5] sm:$0xff]  ;;  %v1510_v5 = vcombine.high %v125_v2, %v125_v2  ;;  %v1512_v6 = vcombine.high %v126_v3, %v126_v3  ;;  %v1509_v7 = vcombine.low %v125_v2, %v125_v2  ;;  %v1762_v9 = vld [vmem:[#allocation7 + $0x4] ss:$16 sps:$4 sm:$0xff]   ;;  %v1760_v13 = vld [vmem:[#allocation7] ss:$16 sps:$4 sm:$0xff]   ;;  %vm137_vm1 = vcmask 64512  }
  0x50   :  { %v1511_v8 = vcombine.low %v126_v3, %v126_v3  ;;  %v120_v12 = vpack.c.bf16 %v119_v4, %v119_v4  ;;  %v1765_v14 = vld [vmem:[#allocation7 + $0xc] ss:$16 sps:$4 sm:$0xff]   ;;  %v1763_v15 = vld [vmem:[#allocation7 + $0x8] ss:$16 sps:$4 sm:$0xff]   ;;  %v117_v18 = vld [vmem:[#allocation3] sm:$0xff]  ;;  %vm256_vm2 = vcmask 130048  }
  0x51   :  { %1513 = vmatprep.subr.msk.bf16.mxu0 %vm141_vm0, %v1510_v5  ;;  %1515 = vmatprep.subr.msk.bf16.mxu1 %vm141_vm0, %v1512_v6  ;;  %v143_v10 = vsel %vm141_vm0, %v1509_v7, 0  ;;  %v1768_v16 = vld [vmem:[#allocation10 + $0xac] ss:$12 sps:$4 sm:$0xff]   ;;  %v118_v19 = vpack.c.bf16 %v117_v18, %v117_v18  ;;  %v1766_v20 = vld [vmem:[#allocation10 + $0xa8] ss:$12 sps:$4 sm:$0xff]   ;;  %vm2060_vm3 = vmmov 0  }
  0x52   :  { %v149_v11 = vsel %vm141_vm0, %v1511_v8, 0  ;;  %169 = vmatpush1.bf16.msra.mxu0 %v143_v10  ;;  %v1771_v17 = vld [vmem:[#allocation10 + $0x22c] ss:$12 sps:$4 sm:$0xff]   ;;  %v1769_v21 = vld [vmem:[#allocation10 + $0x228] ss:$12 sps:$4 sm:$0xff]   ;;  %vm1499_vm4 = vcmask 7168  }
  0x53   :  { %210 = vmatpush1.bf16.msra.mxu1 %v149_v11  ;;  %274 = vmatprep.subr.bf16.mxu0 %v1762_v9  ;;  %v1774_v22 = vld [vmem:[#allocation10 + $0x94] ss:$12 sps:$4 sm:$0xff]   ;;  %v1772_v24 = vld [vmem:[#allocation10 + $0x90] ss:$12 sps:$4 sm:$0xff]   ;;  %v1778_v28 = vld [vmem:[#allocation10 + $0x78] ss:$12 sps:$4 sm:$0xff]  }
  0x54   :  { %315 = vmatprep.subr.bf16.mxu1 %v1765_v14  ;;  %v1777_v23 = vld [vmem:[#allocation10 + $0x214] ss:$12 sps:$4 sm:$0xff]   ;;  %v1775_v25 = vld [vmem:[#allocation10 + $0x210] ss:$12 sps:$4 sm:$0xff]   ;;  %v1781_v29 = vld [vmem:[#allocation10 + $0x1f8] ss:$12 sps:$4 sm:$0xff]  }
  0x55   :  { %1514 = vmatmul.mubr.msk.bf16.vlgmr.msra.gmra.mxu0 %vm137_vm1, %v120_v12  ;;  %v1780_v26 = vld [vmem:[#allocation10 + $0x7c] ss:$12 sps:$4 sm:$0xff]   ;;  %v1786_v30 = vld [vmem:[#allocation10 + $0x64] ss:$12 sps:$4 sm:$0xff]   ;;  %v1784_v32 = vld [vmem:[#allocation10 + $0x60] ss:$12 sps:$4 sm:$0xff]  }
  0x56   :  { %1516 = vmatmul.mubr.msk.bf16.vlgmr.msra.gmra.mxu1 %vm137_vm1, %v120_v12  ;;  %275 = vmatpush1.bf16.msra.mxu0 %v1760_v13  ;;  %v1783_v27 = vld [vmem:[#allocation10 + $0x1fc] ss:$12 sps:$4 sm:$0xff]   ;;  %v1789_v31 = vld [vmem:[#allocation10 + $0x1e4] ss:$12 sps:$4 sm:$0xff]   ;;  %v1787_v33 = vld [vmem:[#allocation10 + $0x1e0] ss:$12 sps:$4 sm:$0xff]  }
  0x57   :  { %316 = vmatpush1.bf16.msra.mxu1 %v1763_v15  ;;  %292 = vmatprep.mubr.bf16.mxu0 %v2058_v1  ;;  %v1792_v34 = vld [vmem:[#allocation10 + $0x4c] ss:$12 sps:$4 sm:$0xff]   ;;  %v1790_v36 = vld [vmem:[#allocation10 + $0x48] ss:$12 sps:$4 sm:$0xff]   ;;  %v1796_v40 = vld [vmem:[#allocation10 + $0x30] ss:$12 sps:$4 sm:$0xff]  }
  0x58   :  { %333 = vmatprep.mubr.bf16.mxu1 %v2058_v1  ;;  %1033 = vmatprep.subr.bf16.mxu0 %v1768_v16  ;;  %v1795_v35 = vld [vmem:[#allocation10 + $0x1cc] ss:$12 sps:$4 sm:$0xff]   ;;  %v1793_v37 = vld [vmem:[#allocation10 + $0x1c8] ss:$12 sps:$4 sm:$0xff]   ;;  %v1799_v41 = vld [vmem:[#allocation10 + $0x1b0] ss:$12 sps:$4 sm:$0xff]  }
  0x59   :  { %1074 = vmatprep.subr.bf16.mxu1 %v1771_v17  ;;  %v1798_v38 = vld [vmem:[#allocation10 + $0x34] ss:$12 sps:$4 sm:$0xff]   ;;  %v1804_v42 = vld [vmem:[#allocation10 + $0x1c] ss:$12 sps:$4 sm:$0xff]   ;;  %v1802_v44 = vld [vmem:[#allocation10 + $0x18] ss:$12 sps:$4 sm:$0xff]  }
  0x5a   :  { %v1801_v39 = vld [vmem:[#allocation10 + $0x1b4] ss:$12 sps:$4 sm:$0xff]   ;;  %v1807_v43 = vld [vmem:[#allocation10 + $0x19c] ss:$12 sps:$4 sm:$0xff]   ;;  %v1805_v45 = vld [vmem:[#allocation10 + $0x198] ss:$12 sps:$4 sm:$0xff]  }
  0x5b   :  { %v1810_v46 = vld [vmem:[#allocation10 + $0x4] ss:$12 sps:$4 sm:$0xff]   ;;  %v1808_v48 = vld [vmem:[#allocation10] ss:$12 sps:$4 sm:$0xff]   ;;  %v1814_v52 = vld [vmem:[#allocation10 + $0x168] ss:$12 sps:$4 sm:$0xff]  }
  0x5c   :  { %v1813_v47 = vld [vmem:[#allocation10 + $0x184] ss:$12 sps:$4 sm:$0xff]   ;;  %v1811_v49 = vld [vmem:[#allocation10 + $0x180] ss:$12 sps:$4 sm:$0xff]   ;;  %v1817_v53 = vld [vmem:[#allocation10 + $0x2e8] ss:$12 sps:$4 sm:$0xff]  }
  0x5d   :  { %1521 = vmatmul.mubr.msk.bf16.vlgmr.msra.gmra.mxu0 %vm256_vm2, %v118_v19  ;;  %v1816_v50 = vld [vmem:[#allocation10 + $0x16c] ss:$12 sps:$4 sm:$0xff]   ;;  %v1822_v54 = vld [vmem:[#allocation10 + $0x154] ss:$12 sps:$4 sm:$0xff]   ;;  %v1820_v56 = vld [vmem:[#allocation10 + $0x150] ss:$12 sps:$4 sm:$0xff]  }
  0x5e   :  { %1522 = vmatmul.mubr.msk.bf16.vlgmr.msra.gmra.mxu1 %vm256_vm2, %v118_v19  ;;  %1034 = vmatpush1.bf16.msra.mxu0 %v1766_v20  ;;  %v1819_v51 = vld [vmem:[#allocation10 + $0x2ec] ss:$12 sps:$4 sm:$0xff]   ;;  %v1825_v55 = vld [vmem:[#allocation10 + $0x2d4] ss:$12 sps:$4 sm:$0xff]   ;;  %v1823_v57 = vld [vmem:[#allocation10 + $0x2d0] ss:$12 sps:$4 sm:$0xff]   ;;  %v344_v20 = vlaneseq }
  0x5f   :  { %1075 = vmatpush1.bf16.msra.mxu1 %v1769_v21  ;;  %1035 = vmatprep.subr.bf16.mxu0 %v1774_v22  ;;  %v1828_v58 = vld [vmem:[#allocation10 + $0x13c] ss:$12 sps:$4 sm:$0xff]   ;;  %v1826_v60 = vld [vmem:[#allocation10 + $0x138] ss:$12 sps:$4 sm:$0xff]   ;;  %v1832_v0 = vld [vmem:[#allocation10 + $0x120] ss:$12 sps:$4 sm:$0xff]  }
  0x60   :  { %1076 = vmatprep.subr.bf16.mxu1 %v1777_v23  ;;  %v1831_v59 = vld [vmem:[#allocation10 + $0x2bc] ss:$12 sps:$4 sm:$0xff]   ;;  %v1829_v61 = vld [vmem:[#allocation10 + $0x2b8] ss:$12 sps:$4 sm:$0xff]   ;;  %v1835_v1 = vld [vmem:[#allocation10 + $0x2a0] ss:$12 sps:$4 sm:$0xff]  }
  0x61   :  { %v1834_v62 = vld [vmem:[#allocation10 + $0x124] ss:$12 sps:$4 sm:$0xff]   ;;  %v1840_v2 = vld [vmem:[#allocation10 + $0x10c] ss:$12 sps:$4 sm:$0xff]   ;;  %v1838_v4 = vld [vmem:[#allocation10 + $0x108] ss:$12 sps:$4 sm:$0xff]  }
  0x62   :  { %1036 = vmatpush1.bf16.msra.mxu0 %v1772_v24  ;;  %v1837_v63 = vld [vmem:[#allocation10 + $0x2a4] ss:$12 sps:$4 sm:$0xff]   ;;  %v1843_v3 = vld [vmem:[#allocation10 + $0x28c] ss:$12 sps:$4 sm:$0xff]   ;;  %v1841_v5 = vld [vmem:[#allocation10 + $0x288] ss:$12 sps:$4 sm:$0xff]  }
  0x63   :  { %1077 = vmatpush1.bf16.msra.mxu1 %v1775_v25  ;;  %1037 = vmatprep.subr.bf16.mxu0 %v1780_v26  ;;  %v1846_v6 = vld [vmem:[#allocation10 + $0xf4] ss:$12 sps:$4 sm:$0xff]   ;;  %v1844_v8 = vld [vmem:[#allocation10 + $0xf0] ss:$12 sps:$4 sm:$0xff]   ;;  %v1850_v12 = vld [vmem:[#allocation10 + $0xd8] ss:$12 sps:$4 sm:$0xff]  }
  0x64   :  { %1078 = vmatprep.subr.bf16.mxu1 %v1783_v27  ;;  %v1849_v7 = vld [vmem:[#allocation10 + $0x274] ss:$12 sps:$4 sm:$0xff]   ;;  %v1847_v9 = vld [vmem:[#allocation10 + $0x270] ss:$12 sps:$4 sm:$0xff]   ;;  %v1853_v13 = vld [vmem:[#allocation10 + $0x258] ss:$12 sps:$4 sm:$0xff]  }
  0x65   :  { %v1852_v10 = vld [vmem:[#allocation10 + $0xdc] ss:$12 sps:$4 sm:$0xff]   ;;  %v1858_v14 = vld [vmem:[#allocation10 + $0xc4] ss:$12 sps:$4 sm:$0xff]   ;;  %v1856_v16 = vld [vmem:[#allocation10 + $0xc0] ss:$12 sps:$4 sm:$0xff]  }
  0x66   :  { %1038 = vmatpush1.bf16.msra.mxu0 %v1778_v28  ;;  %v1855_v11 = vld [vmem:[#allocation10 + $0x25c] ss:$12 sps:$4 sm:$0xff]   ;;  %v1861_v15 = vld [vmem:[#allocation10 + $0x244] ss:$12 sps:$4 sm:$0xff]   ;;  %v1859_v17 = vld [vmem:[#allocation10 + $0x240] ss:$12 sps:$4 sm:$0xff]  }
  0x67   :  { %1079 = vmatpush1.bf16.msra.mxu1 %v1781_v29  ;;  %1039 = vmatprep.subr.bf16.mxu0 %v1786_v30  ;;  %v1862_v18 = vld [vmem:[#allocation10 + $0x170] ss:$12 sps:$4 sm:$0xff]   ;;  %v2142_v21 = vshrl.u32 %v344_v20, 7  ;;  %v1885_v20 = vld [vmem:[#allocation10 + $0x1b8] ss:$12 sps:$4 sm:$0xff]  }
  0x68   :  { %1080 = vmatprep.subr.bf16.mxu1 %v1789_v31  ;;  %v1863_v19 = vld [vmem:[#allocation10 + $0x2f0] ss:$12 sps:$4 sm:$0xff]  }
  0x69   :  { %v346_v26 = vsub.s32 0, %v2142_v21  ;;  %v354_v27 = vsub.s32 2, %v2142_v21  ;;  %v342_v30 = vld [vmem:[%s2187_s4] sm:$0xf]  ;;  %v350_v31 = vsub.s32 1, %v2142_v21 }
  0x6a   :  { %1040 = vmatpush1.bf16.msra.mxu0 %v1784_v32  ;;  %v358_v32 = vsub.s32 3, %v2142_v21  ;;  %v1619_v21 = vld [vmem:[%s2191_s8] ss:$0 sm:$0xff] }
  0x6b   :  { %1081 = vmatpush1.bf16.msra.mxu1 %v1787_v33  ;;  %1041 = vmatprep.subr.bf16.mxu0 %v1792_v34 }
  0x6c   :  { %1082 = vmatprep.subr.bf16.mxu1 %v1795_v35  ;;  %v347_v35 = vrot.slane %v342_v30, %v346_v26 }
  0x6e   :  { %1042 = vmatpush1.bf16.msra.mxu0 %v1790_v36  ;;  %v355_v36 = vrot.slane %v342_v30, %v354_v27 }
  0x6f   :  { %1083 = vmatpush1.bf16.msra.mxu1 %v1793_v37  ;;  %1043 = vmatprep.subr.bf16.mxu0 %v1798_v38 }
  0x70   :  { %1084 = vmatprep.subr.bf16.mxu1 %v1801_v39 }
  0x72   :  { %1044 = vmatpush1.bf16.msra.mxu0 %v1796_v40 }
  0x73   :  { %1085 = vmatpush1.bf16.msra.mxu1 %v1799_v41  ;;  %1045 = vmatprep.subr.bf16.mxu0 %v1804_v42  ;;  %v351_v41 = vrot.slane %v342_v30, %v350_v31  ;;  %v359_v42 = vrot.slane %v342_v30, %v358_v32  ;;  %v1892_v30 = vld [vmem:[#allocation10 + $0x8] ss:$12 sps:$4 sm:$0xff]  }
  0x74   :  { %1086 = vmatprep.subr.bf16.mxu1 %v1807_v43  ;;  %v1893_v32 = vld [vmem:[#allocation10 + $0x188] ss:$12 sps:$4 sm:$0xff]  }
  0x76   :  { %1046 = vmatpush1.bf16.msra.mxu0 %v1802_v44 }
  0x77   :  { %1087 = vmatpush1.bf16.msra.mxu1 %v1805_v45  ;;  %1047 = vmatprep.subr.bf16.mxu0 %v1810_v46 }
  0x78   :  { %1088 = vmatprep.subr.bf16.mxu1 %v1813_v47 }
  0x7a   :  { %1048 = vmatpush1.bf16.msra.mxu0 %v1808_v48 }
  0x7b   :  { %1089 = vmatpush1.bf16.msra.mxu1 %v1811_v49  ;;  %1049 = vmatprep.subr.bf16.mxu0 %v1816_v50 }
  0x7c   :  { %1090 = vmatprep.subr.bf16.mxu1 %v1819_v51 }
  0x7e   :  { %1050 = vmatpush2.bf16.msra.mxu0 %v1814_v52 }
  0x7f   :  { %1091 = vmatpush2.bf16.msra.mxu1 %v1817_v53  ;;  %1051 = vmatprep.subr.bf16.mxu0 %v1822_v54 }
  0x80   :  { %1092 = vmatprep.subr.bf16.mxu1 %v1825_v55 }
  0x82   :  { %1052 = vmatpush2.bf16.msra.mxu0 %v1820_v56 }
  0x83   :  { %1093 = vmatpush2.bf16.msra.mxu1 %v1823_v57  ;;  %1053 = vmatprep.subr.bf16.mxu0 %v1828_v58 }
  0x84   :  { %1094 = vmatprep.subr.bf16.mxu1 %v1831_v59 }
  0x86   :  { %1054 = vmatpush2.bf16.msra.mxu0 %v1826_v60 }
  0x87   :  { %1095 = vmatpush2.bf16.msra.mxu1 %v1829_v61  ;;  %1055 = vmatprep.subr.bf16.mxu0 %v1834_v62  ;;  %v1864_v61 = vld [vmem:[#allocation10 + $0xb0] ss:$12 sps:$4 sm:$0xff]  }
  0x88   :  { %1096 = vmatprep.subr.bf16.mxu1 %v1837_v63  ;;  %v1865_v62 = vld [vmem:[#allocation10 + $0x230] ss:$12 sps:$4 sm:$0xff]  }
  0x8a   :  { %1056 = vmatpush2.bf16.msra.mxu0 %v1832_v0 }
  0x8b   :  { %1097 = vmatpush2.bf16.msra.mxu1 %v1835_v1  ;;  %1057 = vmatprep.subr.bf16.mxu0 %v1840_v2  ;;  %v1866_v1 = vld [vmem:[#allocation10 + $0x158] ss:$12 sps:$4 sm:$0xff]  }
  0x8c   :  { %1098 = vmatprep.subr.bf16.mxu1 %v1843_v3  ;;  %v1867_v2 = vld [vmem:[#allocation10 + $0x2d8] ss:$12 sps:$4 sm:$0xff]  }
  0x8d   :  { %v1868_v3 = vld [vmem:[#allocation10 + $0x98] ss:$12 sps:$4 sm:$0xff]  }
  0x8e   :  { %1058 = vmatpush2.bf16.msra.mxu0 %v1838_v4  ;;  %v1869_v4 = vld [vmem:[#allocation10 + $0x218] ss:$12 sps:$4 sm:$0xff]  }
  0x8f   :  { %1099 = vmatpush2.bf16.msra.mxu1 %v1841_v5  ;;  %1059 = vmatprep.subr.bf16.mxu0 %v1846_v6  ;;  %v1870_v5 = vld [vmem:[#allocation10 + $0x140] ss:$12 sps:$4 sm:$0xff]  }
  0x90   :  { %1100 = vmatprep.subr.bf16.mxu1 %v1849_v7  ;;  %v1871_v6 = vld [vmem:[#allocation10 + $0x2c0] ss:$12 sps:$4 sm:$0xff]  }
  0x91   :  { %v1872_v7 = vld [vmem:[#allocation10 + $0x80] ss:$12 sps:$4 sm:$0xff]  }
  0x92   :  { %1060 = vmatpush2.bf16.msra.mxu0 %v1844_v8  ;;  %v1873_v8 = vld [vmem:[#allocation10 + $0x200] ss:$12 sps:$4 sm:$0xff]  }
  0x93   :  { %1101 = vmatpush2.bf16.msra.mxu1 %v1847_v9  ;;  %1061 = vmatprep.subr.bf16.mxu0 %v1852_v10  ;;  %v1874_v9 = vld [vmem:[#allocation10 + $0x128] ss:$12 sps:$4 sm:$0xff]  }
  0x94   :  { %1102 = vmatprep.subr.bf16.mxu1 %v1855_v11  ;;  %v1875_v10 = vld [vmem:[#allocation10 + $0x2a8] ss:$12 sps:$4 sm:$0xff]  }
  0x95   :  { %v1876_v11 = vld [vmem:[#allocation10 + $0x68] ss:$12 sps:$4 sm:$0xff]  }
  0x96   :  { %1062 = vmatpush2.bf16.msra.mxu0 %v1850_v12  ;;  %v1877_v12 = vld [vmem:[#allocation10 + $0x1e8] ss:$12 sps:$4 sm:$0xff]  }
  0x97   :  { %1103 = vmatpush2.bf16.msra.mxu1 %v1853_v13  ;;  %1063 = vmatprep.subr.bf16.mxu0 %v1858_v14  ;;  %v1878_v13 = vld [vmem:[#allocation10 + $0x110] ss:$12 sps:$4 sm:$0xff]  }
  0x98   :  { %1104 = vmatprep.subr.bf16.mxu1 %v1861_v15  ;;  %v1879_v14 = vld [vmem:[#allocation10 + $0x290] ss:$12 sps:$4 sm:$0xff]  }
  0x99   :  { %v1880_v15 = vld [vmem:[#allocation10 + $0x50] ss:$12 sps:$4 sm:$0xff]  }
  0x9a   :  { %1064 = vmatpush2.bf16.msra.mxu0 %v1856_v16  ;;  %v1881_v16 = vld [vmem:[#allocation10 + $0x1d0] ss:$12 sps:$4 sm:$0xff]  }
  0x9b   :  { %1105 = vmatpush2.bf16.msra.mxu1 %v1859_v17  ;;  %1646 = vmatprep.subr.bf16.mxu0 %v1862_v18  ;;  %v1882_v17 = vld [vmem:[#allocation10 + $0xf8] ss:$12 sps:$4 sm:$0xff]  }
  0x9c   :  { %1668 = vmatprep.subr.bf16.mxu1 %v1863_v19  ;;  %v1883_v18 = vld [vmem:[#allocation10 + $0x278] ss:$12 sps:$4 sm:$0xff]  }
  0x9d   :  { %v1884_v19 = vld [vmem:[#allocation10 + $0x38] ss:$12 sps:$4 sm:$0xff]  }
 0x115   :  { %v188_v22 = vpop.f32.mrf.mxu0 }
 0x116   :  { %v229_v23 = vpop.f32.mrf.mxu1 }
 0x117   :  { %v190_v24 = vpop.f32.mrf.mxu0 }
 0x118   :  { %v231_v25 = vpop.f32.mrf.mxu1 }
 0x119   :  { %v192_v28 = vpop.f32.mrf.mxu0 }
 0x11a   :  { %v233_v29 = vpop.f32.mrf.mxu1  ;;  %v1890_v28 = vld [vmem:[#allocation10 + $0xc8] ss:$12 sps:$4 sm:$0xff]  }
 0x11b   :  { %v193_v33 = vpop.f32.mrf.mxu0  ;;  %v1891_v29 = vld [vmem:[#allocation10 + $0x248] ss:$12 sps:$4 sm:$0xff]  }
 0x11c   :  { %v234_v34 = vpop.f32.mrf.mxu1  ;;  %v1894_v33 = vld [vmem:[#allocation11 + $0x78] sm:$0xff]  }
 0x11d   :  { %v294_v37 = vpop.f32.mrf.mxu0  ;;  %v1895_v34 = vld [vmem:[#allocation11 + $0x38] sm:$0xff]  }
 0x11e   :  { %v335_v38 = vpop.f32.mrf.mxu1  ;;  %v295_v39 = vadd.f32 %v294_v37, %v188_v22  ;;  %v1886_v22 = vld [vmem:[#allocation10 + $0xe0] ss:$12 sps:$4 sm:$0xff]  }
 0x11f   :  { %v336_v40 = vadd.f32 %v335_v38, %v229_v23  ;;  %v296_v43 = vpop.f32.mrf.mxu0  ;;  %v1887_v23 = vld [vmem:[#allocation10 + $0x260] ss:$12 sps:$4 sm:$0xff]  }
 0x120   :  { %v337_v44 = vpop.f32.mrf.mxu1  ;;  %v364_v45 = vadd.f32 %v347_v35, %v295_v39  ;;  %v297_v47 = vadd.f32 %v296_v43, %v190_v24  ;;  %v1888_v24 = vld [vmem:[#allocation10 + $0x20] ss:$12 sps:$4 sm:$0xff]   ;;  %v1896_v35 = vld [vmem:[#allocation11 + $0x70] sm:$0xff]  }
 0x121   :  { %v366_v46 = vadd.f32 %v355_v36, %v336_v40  ;;  %v338_v48 = vadd.f32 %v337_v44, %v231_v25  ;;  %v298_v49 = vpop.f32.mrf.mxu0  ;;  %v1889_v25 = vld [vmem:[#allocation10 + $0x1a0] ss:$12 sps:$4 sm:$0xff]   ;;  %v1897_v36 = vld [vmem:[#allocation11 + $0x30] sm:$0xff]  }
 0x122   :  { %v339_v50 = vpop.f32.mrf.mxu1  ;;  %v365_v51 = vadd.f32 %v351_v41, %v297_v47  ;;  %v368_v53 = vmax.f32 %v364_v45, 0.0  ;;  %v1898_v37 = vld [vmem:[#allocation11 + $0x68] sm:$0xff]   ;;  %v1900_v39 = vld [vmem:[#allocation11 + $0x60] sm:$0xff]   ;;  %v1902_v41 = vld [vmem:[#allocation11 + $0x58] sm:$0xff]  }
 0x123   :  { %v367_v52 = vadd.f32 %v359_v42, %v338_v48  ;;  %v370_v54 = vmax.f32 %v366_v46, 0.0  ;;  %v299_v55 = vpop.f32.mrf.mxu0  ;;  %v1899_v38 = vld [vmem:[#allocation11 + $0x28] sm:$0xff]   ;;  %v1901_v40 = vld [vmem:[#allocation11 + $0x20] sm:$0xff]   ;;  %v1903_v42 = vld [vmem:[#allocation11 + $0x18] sm:$0xff]   ;;  %v2059_v50 = vmov 0.0  }
 0x124   :  { %v340_v56 = vpop.f32.mrf.mxu1  ;;  %v369_v57 = vmax.f32 %v365_v51, 0.0  ;;  %v2157_v63 = vpack.c.bf16 %v368_v53, %v368_v53  ;;  %v1904_v43 = vld [vmem:[#allocation11 + $0x50] sm:$0xff]   ;;  %v1906_v45 = vld [vmem:[#allocation11 + $0x48] sm:$0xff]   ;;  %v1908_v47 = vld [vmem:[#allocation11 + $0x40] sm:$0xff]  }
 0x125   :  { %v371_v58 = vmax.f32 %v367_v52, 0.0  ;;  %v2159_v0 = vpack.c.bf16 %v370_v54, %v370_v54  ;;  %v1905_v44 = vld [vmem:[#allocation11 + $0x10] sm:$0xff]   ;;  %v1907_v46 = vld [vmem:[#allocation11 + $0x8] sm:$0xff]   ;;  %v1909_v48 = vld [vmem:[#allocation11] sm:$0xff]  }
 0x126   :  { %v373_v59 = vpack.c.bf16 %v369_v57, %v369_v57  ;;  %v1910_v49 = vld [vmem:[#allocation11 + $0xb8] sm:$0xff]   ;;  %v1911_v51 = vld [vmem:[#allocation11 + $0xb0] sm:$0xff]   ;;  %v1912_v52 = vld [vmem:[#allocation11 + $0xa8] sm:$0xff]  }
 0x127   :  { %v375_v60 = vpack.c.bf16 %v371_v58, %v371_v58  ;;  %v1913_v53 = vld [vmem:[#allocation11 + $0xa0] sm:$0xff]   ;;  %v1914_v54 = vld [vmem:[#allocation11 + $0x98] sm:$0xff]   ;;  %v1915_v55 = vld [vmem:[#allocation11 + $0x90] sm:$0xff]  }
 0x128   :  { %1065 = vmatprep.mubr.bf16.mxu0 %v373_v59  ;;  %v1916_v56 = vld [vmem:[#allocation11 + $0x88] sm:$0xff]   ;;  %v1917_v57 = vld [vmem:[#allocation11 + $0x80] sm:$0xff]  }
 0x129   :  { %1106 = vmatprep.mubr.bf16.mxu1 %v375_v60  ;;  %1066 = vmatmul.mubr.bf16.vlgmr.msra.gmra.mxu0 %v2157_v63  ;;  %v504_v58 = vld [vmem:[%s2189_s6] sm:$0x7] }
 0x12a   :  { %1107 = vmatmul.mubr.bf16.vlgmr.msra.gmra.mxu1 %v2159_v0  ;;  %1647 = vmatpush3.bf16.msra.mxu0 %v1864_v61 }
 0x12b   :  { %1669 = vmatpush3.bf16.msra.mxu1 %v1865_v62  ;;  %1147 = vmatprep.mubr.bf16.mxu0 %v373_v59  ;;  %v509_v59 = vrot.slane %v504_v58, %v346_v26 }
 0x12c   :  { %1187 = vmatprep.mubr.bf16.mxu1 %v375_v60  ;;  %1648 = vmatprep.subr.bf16.mxu0 %v1866_v1  ;;  %v513_v60 = vrot.slane %v504_v58, %v350_v31 }
 0x12d   :  { %1670 = vmatprep.subr.bf16.mxu1 %v1867_v2 }
 0x12e   :  { %1649 = vmatpush3.bf16.msra.mxu0 %v1868_v3 }
 0x12f   :  { %1671 = vmatpush3.bf16.msra.mxu1 %v1869_v4  ;;  %1650 = vmatprep.subr.bf16.mxu0 %v1870_v5 }
 0x130   :  { %1672 = vmatprep.subr.bf16.mxu1 %v1871_v6 }
 0x132   :  { %1651 = vmatpush3.bf16.msra.mxu0 %v1872_v7 }
 0x133   :  { %1673 = vmatpush3.bf16.msra.mxu1 %v1873_v8  ;;  %1652 = vmatprep.subr.bf16.mxu0 %v1874_v9 }
 0x134   :  { %1674 = vmatprep.subr.bf16.mxu1 %v1875_v10 }
 0x136   :  { %1653 = vmatpush3.bf16.msra.mxu0 %v1876_v11 }
 0x137   :  { %1675 = vmatpush3.bf16.msra.mxu1 %v1877_v12  ;;  %1654 = vmatprep.subr.bf16.mxu0 %v1878_v13  ;;  %v517_v13 = vrot.slane %v504_v58, %v354_v27 }
 0x138   :  { %1676 = vmatprep.subr.bf16.mxu1 %v1879_v14 }
 0x13a   :  { %1655 = vmatpush3.bf16.msra.mxu0 %v1880_v15 }
 0x13b   :  { %1677 = vmatpush3.bf16.msra.mxu1 %v1881_v16  ;;  %1656 = vmatprep.subr.bf16.mxu0 %v1882_v17 }
 0x13c   :  { %1678 = vmatprep.subr.bf16.mxu1 %v1883_v18 }
 0x13e   :  { %1657 = vmatpush3.bf16.msra.mxu0 %v1884_v19 }
 0x13f   :  { %1679 = vmatpush3.bf16.msra.mxu1 %v1885_v20  ;;  %1658 = vmatprep.subr.bf16.mxu0 %v1886_v22 }
 0x140   :  { %1680 = vmatprep.subr.bf16.mxu1 %v1887_v23 }
 0x142   :  { %1659 = vmatpush3.bf16.msra.mxu0 %v1888_v24 }
 0x143   :  { %1681 = vmatpush3.bf16.msra.mxu1 %v1889_v25  ;;  %1660 = vmatprep.subr.bf16.mxu0 %v1890_v28 }
 0x144   :  { %1682 = vmatprep.subr.bf16.mxu1 %v1891_v29 }
 0x146   :  { %1661 = vmatpush3.bf16.msra.mxu0 %v1892_v30 }
 0x147   :  { %1683 = vmatpush3.bf16.msra.mxu1 %v1893_v32  ;;  %1690 = vmatprep.subr.bf16.mxu0 %v1894_v33 }
 0x148   :  { %1721 = vmatprep.subr.bf16.mxu1 %v2059_v50 }
 0x149   :  { %1148 = vmatmul.mubr.bf16.vlgmr.msra.gmra.mxu0 %v2157_v63 }
 0x14a   :  { %1188 = vmatmul.mubr.bf16.vlgmr.msra.gmra.mxu1 %v2159_v0  ;;  %1691 = vmatpush3.bf16.msra.mxu0 %v1895_v34 }
 0x14b   :  { %1692 = vmatprep.subr.bf16.mxu0 %v1896_v35  ;;  %1722 = vmatpush3.bf16.msra.mxu1 %v1910_v49 }
 0x14c   :  { %1723 = vmatprep.subr.bf16.mxu1 %v2059_v50  ;;  %1737 = vmatprep.mubr.msk.bf16.mxu1 %vm2060_vm3, %v2059_v50 }
 0x14e   :  { %1693 = vmatpush3.bf16.msra.mxu0 %v1897_v36 }
 0x14f   :  { %1694 = vmatprep.subr.bf16.mxu0 %v1898_v37  ;;  %1724 = vmatpush3.bf16.msra.mxu1 %v1911_v51 }
 0x150   :  { %1725 = vmatprep.subr.bf16.mxu1 %v2059_v50 }
 0x152   :  { %1695 = vmatpush3.bf16.msra.mxu0 %v1899_v38  ;;  %v1644_v38 = vld [vmem:[%s2192_s9] ss:$0 sm:$0xff] }
 0x153   :  { %1696 = vmatprep.subr.bf16.mxu0 %v1900_v39  ;;  %1726 = vmatpush3.bf16.msra.mxu1 %v1912_v52 }
 0x154   :  { %1727 = vmatprep.subr.bf16.mxu1 %v2059_v50 }
 0x156   :  { %1697 = vmatpush3.bf16.msra.mxu0 %v1901_v40 }
 0x157   :  { %1698 = vmatprep.subr.bf16.mxu0 %v1902_v41  ;;  %1728 = vmatpush3.bf16.msra.mxu1 %v1913_v53 }
 0x158   :  { %1729 = vmatprep.subr.bf16.mxu1 %v2059_v50 }
 0x15a   :  { %1699 = vmatpush3.bf16.msra.mxu0 %v1903_v42 }
 0x15b   :  { %1700 = vmatprep.subr.bf16.mxu0 %v1904_v43  ;;  %1730 = vmatpush3.bf16.msra.mxu1 %v1914_v54  ;;  %v1645_v43 = vld [vmem:[#allocation2] ss:$0 sm:$0xff] }
 0x15c   :  { %1731 = vmatprep.subr.bf16.mxu1 %v2059_v50 }
 0x15e   :  { %1701 = vmatpush3.bf16.msra.mxu0 %v1905_v44 }
 0x15f   :  { %1702 = vmatprep.subr.bf16.mxu0 %v1906_v45  ;;  %1732 = vmatpush3.bf16.msra.mxu1 %v1915_v55 }
 0x160   :  { %1733 = vmatprep.subr.bf16.mxu1 %v2059_v50 }
 0x162   :  { %1703 = vmatpush3.bf16.msra.mxu0 %v1907_v46 }
 0x163   :  { %1704 = vmatprep.subr.bf16.mxu0 %v1908_v47  ;;  %1734 = vmatpush3.bf16.msra.mxu1 %v1916_v56 }
 0x164   :  { %1735 = vmatprep.subr.bf16.mxu1 %v2059_v50 }
 0x166   :  { %1705 = vmatpush3.bf16.msra.mxu0 %v1909_v48 }
 0x167   :  { %1736 = vmatpush3.bf16.msra.mxu1 %v1917_v57 }
 0x1e9   :  { %v1067_v61 = vpop.f32.mrf.mxu0 }
 0x1ea   :  { %v1108_v62 = vpop.f32.mrf.mxu1  ;;  %v1068_v63 = vadd.f32 %v1067_v61, %v509_v59 }
 0x1eb   :  { %v1069_v0 = vpop.f32.mrf.mxu0 }
 0x1ec   :  { %v1110_v1 = vpop.f32.mrf.mxu1  ;;  %v1109_v2 = vadd.f32 %v1108_v62, %v1068_v63  ;;  %v1070_v3 = vadd.f32 %v1069_v0, %v513_v60 }
 0x1ed   :  { %v1071_v4 = vpop.f32.mrf.mxu0 }
 0x1ee   :  { %v1112_v5 = vpop.f32.mrf.mxu1  ;;  %v1111_v6 = vadd.f32 %v1110_v1, %v1070_v3  ;;  %v1195_v7 = vmax.f32 %v1109_v2, 0.0 }
 0x1ef   :  { %v1072_v8 = vpop.f32.mrf.mxu0 }
 0x1f0   :  { %v1113_v9 = vpop.f32.mrf.mxu1  ;;  %v1196_v10 = vmax.f32 %v1111_v6, 0.0  ;;  %v1198_v12 = vpack.c.bf16 %v1195_v7, %v1195_v7 }
 0x1f2   :  { %v1199_v11 = vpack.c.bf16 %v1196_v10, %v1196_v10 }
 0x1f4   :  { %1432 = vmatprep.mubr.bf16.mxu0 %v1199_v11 }
 0x1f5   :  { %1433 = vmatmul.mubr.bf16.vlgmr.msra.gmra.mxu0 %v1198_v12 }
 0x209   :  { %v1662_v26 = vpop.f32.mrf.mxu0 }
 0x20a   :  { %v1684_v31 = vpop.f32.mrf.mxu1 }
 0x20b   :  { %v1663_v14 = vpop.f32.mrf.mxu0 }
 0x20c   :  { %v1685_v15 = vpop.f32.mrf.mxu1  ;;  %v1664_v16 = vadd.f32 %v1663_v14, %v1662_v26 }
 0x20d   :  { %v1665_v17 = vpop.f32.mrf.mxu0  ;;  %v1686_v20 = vadd.f32 %v1685_v15, %v1684_v31 }
 0x20e   :  { %v1687_v18 = vpop.f32.mrf.mxu1  ;;  %v1150_v19 = vadd.f32 %v1664_v16, %v517_v13 }
 0x20f   :  { %v1666_v22 = vpop.f32.mrf.mxu0 }
 0x210   :  { %v1688_v23 = vpop.f32.mrf.mxu1  ;;  %v1190_v24 = vadd.f32 %v1686_v20, %v1150_v19 }
 0x212   :  { %v1197_v25 = vmax.f32 %v1190_v24, 0.0 }
 0x214   :  { %v1200_v28 = vpack.c.bf16 %v1197_v25, %v1197_v25 }
 0x216   :  { %1738 = vmatmul.mubr.bf16.vlgmr.msra.gmra.mxu1 %v1200_v28 }
 0x2b5   :  { %v1706_v29 = vpop.f32.mrf.mxu0 }
 0x2b7   :  { %v1707_v30 = vpop.f32.mrf.mxu0 }
 0x2b8   :  { %v1708_v34 = vadd.f32 %v1707_v30, %v1706_v29 }
 0x2b9   :  { %v1709_v32 = vpop.f32.mrf.mxu0 }
 0x2ba   :  { %v1435_v27 = vadd.f32 %v1708_v34, %v1619_v21 }
 0x2bb   :  { %v1710_v33 = vpop.f32.mrf.mxu0 }
 0x2d6   :  { %v1474_v35 = vpop.f32.mrf.mxu1 }
 0x2d7   :  { %v1475_v36 = vadd.f32 %v1474_v35, %v1435_v27 }
 0x2d8   :  { %v1739_v37 = vpop.f32.mrf.mxu1 }
 0x2d9   :  { %v1480_v39 = vmax.f32 %v1475_v36, 0.0 }
 0x2da   :  { %v1477_v40 = vpop.f32.mrf.mxu1 }
 0x2db   :  { %v1488_v41 = vmul.f32 %v1644_v38, %v1480_v39 }
 0x2dc   :  { %v1740_v42 = vpop.f32.mrf.mxu1 }
 0x2dd   :  { %1489 = vadd.xlane.f32.xlu0 %v1488_v41 }
 0x366   :  { %v1490_v44 = vpop.xlane.xlu0 %1489 }
 0x367   :  { %v1498_v45 = vadd.f32 %v1645_v43, %v1490_v44 }
 0x369   :  { %1500 = vst.msk [vmem:[%s2194_s11] sm:$0xff] %vm1499_vm4, %v1498_v45 }
 0x36a   :  { %1505 = vsyncpa [#allocation4], 1 }
 0x36b   :  { %1506 = vsyncpa [#allocation6], 1 }
 0x36c   :  { %1507 = vsyncpa [#allocation9], 1 }
 0x36d   :  { %1508 = vsyncpa [#allocation12], 1 }

</bundles_post_ra>
